<compile_context>
chip_gen: v7x
topology: tpu7x:2x2x1
jax: 0.10.0
libtpu: 0.0.40
codegen_flags: <defaults>
</compile_context>

<pallas_src>
import functools

import jax
import jax.numpy as jnp
from jax import lax
from jax.experimental import pallas as pl
from jax.experimental.pallas import tpu as pltpu


def _dw_kernel(x_ref, w_ref, b_ref, o_ref, pad_ref, *, H, W, pad, act, activation):
    """One (BC, H*W) block -> conv3x3 + bias + activation, via a flat zero-padded scratch."""
    HW = H * W
    bc = x_ref.shape[0]

    # ---- in-kernel zero padding: scratch row layout is [pad zeros | H*W data | pad zeros] ----
    pad_ref[:, :pad] = jnp.zeros((bc, pad), jnp.float32)
    pad_ref[:, pad + HW:] = jnp.zeros((bc, pad), jnp.float32)
    pad_ref[:, pad:pad + HW] = x_ref[...].astype(jnp.float32)

    # ---- column-boundary masks (flat shifts by dj=+-1 wrap across rows; zero those taps) ----
    col = lax.broadcasted_iota(jnp.int32, (1, HW), 1) % W
    has_left = (col >= 1).astype(jnp.float32)        # j-1 exists   (dj = -1 taps)
    has_right = (col <= W - 2).astype(jnp.float32)   # j+1 exists   (dj = +1 taps)

    # ---- 3x3 cross-correlation as 9 statically shifted flat taps read from the ref ----
    def tap(di, dj):
        s = pad + di * W + dj
        return pad_ref[:, s:s + HW]                  # (bc, HW) f32, static lane-offset load

    # group by column offset dj so each column mask is applied exactly once
    u_left = (w_ref[0, 0] * tap(-1, -1) + w_ref[1, 0] * tap(0, -1) + w_ref[2, 0] * tap(1, -1))
    u_mid = (w_ref[0, 1] * tap(-1, 0) + w_ref[1, 1] * tap(0, 0) + w_ref[2, 1] * tap(1, 0))
    u_right = (w_ref[0, 2] * tap(-1, 1) + w_ref[1, 2] * tap(0, 1) + w_ref[2, 2] * tap(1, 1))

    acc = u_mid + has_left * u_left + has_right * u_right + b_ref[0]

    if act:
        if activation == "relu":
            acc = jnp.maximum(acc, 0.0)
        elif activation == "lrelu":
            acc = jnp.where(acc >= 0.0, acc, 0.01 * acc)   # nn.LeakyReLU default slope
        elif activation == "tanh":
            acc = jnp.tanh(acc)
        else:
            raise ValueError(f"unknown activation: {activation}")
    o_ref[...] = acc.astype(o_ref.dtype)


def _pick_bc(nc, hw, pad, in_bytes, out_bytes, budget_bytes=6 << 20):
    """Channel-block size.  Accounts for double-buffered in/out blocks, the padded scratch and
    ~5 live f32 temporaries per row, so the total stays well under v5e's 16 MiB / v7x's 32 MiB
    default scoped-VMEM limits."""
    per_row = 2 * hw * (in_bytes + out_bytes) + (2 * pad + hw) * 4 + 5 * hw * 4
    bc = max(8, (budget_bytes // per_row) // 8 * 8)
    # Either bc is a multiple of 8 (cdiv grid handles a partial last block) or it equals nc.
    return int(min(bc, nc))


def depthwise_block_forward(x, weight, bias, *, act=True, activation="relu"):
    """x: (N, C, H, W), weight: (3, 3), bias: (1,) -> (N, C, H, W) in x.dtype."""
    N, C, H, W = x.shape
    NC, HW = N * C, H * W
    xf = x.reshape(NC, HW)                       # free bitcast reshape (contiguous NCHW)
    w = weight.astype(jnp.float32)
    b = bias.astype(jnp.float32)

    pad = ((W + 1 + 127) // 128) * 128           # flat zero pad per side (>= one row + 1)
    in_b = x.dtype.itemsize
    out_b = in_b
    BC = _pick_bc(NC, HW, pad, in_b, out_b)
    grid = (pl.cdiv(NC, BC),)

    cost = pl.CostEstimate(
        flops=18 * NC * HW,
        transcendentals=NC * HW if (act and activation == "tanh") else 0,
        bytes_accessed=NC * HW * (in_b + out_b) + 9 * 4 + 4,
    )

    out = pl.pallas_call(
        functools.partial(_dw_kernel, H=H, W=W, pad=pad, act=act, activation=activation),
        out_shape=jax.ShapeDtypeStruct((NC, HW), x.dtype),
        grid_spec=pltpu.PrefetchScalarGridSpec(
            num_scalar_prefetch=0,
            grid=grid,
            in_specs=[
                pl.BlockSpec((BC, HW), lambda i: (i, 0)),
                pl.BlockSpec(memory_space=pltpu.MemorySpace.SMEM),   # (3, 3) weight scalars
                pl.BlockSpec(memory_space=pltpu.MemorySpace.SMEM),   # (1,) bias scalar
            ],
            out_specs=pl.BlockSpec((BC, HW), lambda i: (i, 0)),
            scratch_shapes=[pltpu.VMEM((BC, 2 * pad + HW), jnp.float32)],
        ),
        compiler_params=pltpu.CompilerParams(
            dimension_semantics=("parallel",),   # shards blocks across v7x's 2 TCs
        ),
        cost_estimate=cost,
    )(xf, w, b)
    return out.reshape(N, C, H, W)


# ---- pure-JAX reference (matches the PyTorch module exactly) ---------------
def reference(x, weight, bias, act=True, activation="relu"):
    N, C, H, W = x.shape
    xr = x.reshape(N * C, 1, H, W)
    out = lax.conv_general_dilated(
        xr, weight.reshape(1, 1, 3, 3),
        window_strides=(1, 1), padding=((1, 1), (1, 1)),
        dimension_numbers=("NCHW", "OIHW", "NCHW"))
    out = (out + bias[0]).reshape(N, C, H, W)
    if act:
        if activation == "relu":
            out = jnp.maximum(out, 0.0)
        elif activation == "lrelu":
            out = jnp.where(out >= 0.0, out, 0.01 * out)
        elif activation == "tanh":
            out = jnp.tanh(out)
    return out


if __name__ == "__main__":
    key = jax.random.PRNGKey(0)
    kx, kw, kb = jax.random.split(key, 3)

    Nb, Cc, Hh, Ww = 2, 4, 16, 16
    x = jax.random.normal(kx, (Nb, Cc, Hh, Ww), jnp.float32)
    # PyTorch Conv2d(1, 1, 3) default init: U(-sqrt(k), sqrt(k)) with k = 1 / (1*3*3)
    bound = 1.0 / 3.0
    w = jax.random.uniform(kw, (3, 3), jnp.float32, -bound, bound)
    b = jax.random.uniform(kb, (1,), jnp.float32, -bound, bound)

    out = depthwise_block_forward(x, w, b, act=True, activation="relu")
    out = jax.block_until_ready(out)

    ref = reference(x, w, b, act=True, activation="relu")
    assert out.shape == (Nb, Cc, Hh, Ww), out.shape
    assert jnp.allclose(out, ref, rtol=1e-5, atol=1e-5), float(jnp.max(jnp.abs(out - ref)))

    print("KERNEL_OK")
</pallas_src>

<mosaic_0001>
module attributes {stable_mosaic.version = 11 : i64} {
  func.func @_dw_kernel(%arg0: i32, %arg1: memref<8x256xf32, #tpu.memory_space<vmem>>, %arg2: memref<3x3xf32, #tpu.memory_space<smem>>, %arg3: memref<1xf32, #tpu.memory_space<smem>>, %arg4: memref<8x256xf32, #tpu.memory_space<vmem>>, %arg5: memref<8x512xf32, #tpu.memory_space<vmem>>) attributes {dimension_semantics = [#tpu.dimension_semantics<parallel>], iteration_bounds = array<i64: 1>, scalar_prefetch = 0 : i64, scratch_operands = 1 : i64, tpu.core_type = #tpu.core_type<tc>, window_params = [{transform_indices = @transform_0, window_bounds = array<i64: 8, 256>}, {transform_indices = @transform_1, window_bounds = array<i64: 3, 3>}, {transform_indices = @transform_2, window_bounds = array<i64: 1>}, {transform_indices = @transform_3, window_bounds = array<i64: 8, 256>}]} {
    %cst = arith.constant 0.000000e+00 : f32
    %0 = vector.broadcast %cst : f32 to vector<8x128xf32>
    %c0 = arith.constant 0 : index
    %c0_0 = arith.constant 0 : index
    %1 = vector.load %arg5[%c0, %c0_0] : memref<8x512xf32, #tpu.memory_space<vmem>>, vector<8x128xf32>
    tpu.vector_store %arg5[%c0, %c0_0], %0 {strides = array<i32>} : memref<8x512xf32, #tpu.memory_space<vmem>>, vector<8x128xf32>,
    %cst_1 = arith.constant 0.000000e+00 : f32
    %2 = vector.broadcast %cst_1 : f32 to vector<8x128xf32>
    %c0_2 = arith.constant 0 : index
    %c384 = arith.constant 384 : index
    %3 = vector.load %arg5[%c0_2, %c384] : memref<8x512xf32, #tpu.memory_space<vmem>>, vector<8x128xf32>
    tpu.vector_store %arg5[%c0_2, %c384], %2 {strides = array<i32>} : memref<8x512xf32, #tpu.memory_space<vmem>>, vector<8x128xf32>,
    %c0_3 = arith.constant 0 : index
    %c0_4 = arith.constant 0 : index
    %4 = vector.load %arg1[%c0_3, %c0_4] : memref<8x256xf32, #tpu.memory_space<vmem>>, vector<8x256xf32>
    %c0_5 = arith.constant 0 : index
    %c128 = arith.constant 128 : index
    %5 = vector.load %arg5[%c0_5, %c128] : memref<8x512xf32, #tpu.memory_space<vmem>>, vector<8x256xf32>
    tpu.vector_store %arg5[%c0_5, %c128], %4 {strides = array<i32>} : memref<8x512xf32, #tpu.memory_space<vmem>>, vector<8x256xf32>,
    %6 = tpu.iota {dimensions = array<i32: 1>} : vector<1x256xi32>
    %c16_i32 = arith.constant 16 : i32
    %c0_i32 = arith.constant 0 : i32
    %7 = arith.cmpi eq, %c16_i32, %c0_i32 : i32
    %c1_i32 = arith.constant 1 : i32
    %8 = arith.select %7, %c1_i32, %c16_i32 : i32
    %9 = vector.broadcast %8 : i32 to vector<1x256xi32>
    %10 = arith.remsi %6, %9 : vector<1x256xi32>
    %c0_i32_6 = arith.constant 0 : i32
    %11 = vector.broadcast %c0_i32_6 : i32 to vector<1x256xi32>
    %12 = arith.cmpi ne, %10, %11 : vector<1x256xi32>
    %c0_i32_7 = arith.constant 0 : i32
    %13 = vector.broadcast %c0_i32_7 : i32 to vector<1x256xi32>
    %14 = arith.cmpi slt, %10, %13 : vector<1x256xi32>
    %c0_i32_8 = arith.constant 0 : i32
    %15 = arith.cmpi slt, %8, %c0_i32_8 : i32
    %16 = vector.broadcast %15 : i1 to vector<1x256xi1>
    %17 = vector.broadcast %16 : vector<1x256xi1> to vector<1x256xi1>
    %18 = arith.xori %14, %17 : vector<1x256xi1>
    %19 = arith.andi %18, %12 : vector<1x256xi1>
    %20 = vector.broadcast %8 : i32 to vector<1x256xi32>
    %21 = arith.addi %10, %20 : vector<1x256xi32>
    %22 = arith.select %19, %21, %10 : vector<1x256xi1>, vector<1x256xi32>
    %c1_i32_9 = arith.constant 1 : i32
    %23 = vector.broadcast %c1_i32_9 : i32 to vector<1x256xi32>
    %24 = arith.cmpi sge, %22, %23 : vector<1x256xi32>
    %25 = arith.extui %24 : vector<1x256xi1> to vector<1x256xi32>
    %26 = arith.sitofp %25 : vector<1x256xi32> to vector<1x256xf32>
    %c14_i32 = arith.constant 14 : i32
    %27 = vector.broadcast %c14_i32 : i32 to vector<1x256xi32>
    %28 = arith.cmpi sle, %22, %27 : vector<1x256xi32>
    %29 = arith.extui %28 : vector<1x256xi1> to vector<1x256xi32>
    %30 = arith.sitofp %29 : vector<1x256xi32> to vector<1x256xf32>
    %c0_10 = arith.constant 0 : index
    %c0_11 = arith.constant 0 : index
    %31 = memref.load %arg2[%c0_10, %c0_11] : memref<3x3xf32, #tpu.memory_space<smem>>
    %c0_12 = arith.constant 0 : index
    %c111 = arith.constant 111 : index
    %32 = vector.load %arg5[%c0_12, %c111] : memref<8x512xf32, #tpu.memory_space<vmem>>, vector<8x256xf32>
    %33 = vector.broadcast %31 : f32 to vector<8x256xf32>
    %34 = arith.mulf %33, %32 : vector<8x256xf32>
    %c1 = arith.constant 1 : index
    %c0_13 = arith.constant 0 : index
    %35 = memref.load %arg2[%c1, %c0_13] : memref<3x3xf32, #tpu.memory_space<smem>>
    %c0_14 = arith.constant 0 : index
    %c127 = arith.constant 127 : index
    %36 = vector.load %arg5[%c0_14, %c127] : memref<8x512xf32, #tpu.memory_space<vmem>>, vector<8x256xf32>
    %37 = vector.broadcast %35 : f32 to vector<8x256xf32>
    %38 = arith.mulf %37, %36 : vector<8x256xf32>
    %39 = arith.addf %34, %38 : vector<8x256xf32>
    %c2 = arith.constant 2 : index
    %c0_15 = arith.constant 0 : index
    %40 = memref.load %arg2[%c2, %c0_15] : memref<3x3xf32, #tpu.memory_space<smem>>
    %c0_16 = arith.constant 0 : index
    %c143 = arith.constant 143 : index
    %41 = vector.load %arg5[%c0_16, %c143] : memref<8x512xf32, #tpu.memory_space<vmem>>, vector<8x256xf32>
    %42 = vector.broadcast %40 : f32 to vector<8x256xf32>
    %43 = arith.mulf %42, %41 : vector<8x256xf32>
    %44 = arith.addf %39, %43 : vector<8x256xf32>
    %c0_17 = arith.constant 0 : index
    %c1_18 = arith.constant 1 : index
    %45 = memref.load %arg2[%c0_17, %c1_18] : memref<3x3xf32, #tpu.memory_space<smem>>
    %c0_19 = arith.constant 0 : index
    %c112 = arith.constant 112 : index
    %46 = vector.load %arg5[%c0_19, %c112] : memref<8x512xf32, #tpu.memory_space<vmem>>, vector<8x256xf32>
    %47 = vector.broadcast %45 : f32 to vector<8x256xf32>
    %48 = arith.mulf %47, %46 : vector<8x256xf32>
    %c1_20 = arith.constant 1 : index
    %c1_21 = arith.constant 1 : index
    %49 = memref.load %arg2[%c1_20, %c1_21] : memref<3x3xf32, #tpu.memory_space<smem>>
    %c0_22 = arith.constant 0 : index
    %c128_23 = arith.constant 128 : index
    %50 = vector.load %arg5[%c0_22, %c128_23] : memref<8x512xf32, #tpu.memory_space<vmem>>, vector<8x256xf32>
    %51 = vector.broadcast %49 : f32 to vector<8x256xf32>
    %52 = arith.mulf %51, %50 : vector<8x256xf32>
    %53 = arith.addf %48, %52 : vector<8x256xf32>
    %c2_24 = arith.constant 2 : index
    %c1_25 = arith.constant 1 : index
    %54 = memref.load %arg2[%c2_24, %c1_25] : memref<3x3xf32, #tpu.memory_space<smem>>
    %c0_26 = arith.constant 0 : index
    %c144 = arith.constant 144 : index
    %55 = vector.load %arg5[%c0_26, %c144] : memref<8x512xf32, #tpu.memory_space<vmem>>, vector<8x256xf32>
    %56 = vector.broadcast %54 : f32 to vector<8x256xf32>
    %57 = arith.mulf %56, %55 : vector<8x256xf32>
    %58 = arith.addf %53, %57 : vector<8x256xf32>
    %c0_27 = arith.constant 0 : index
    %c2_28 = arith.constant 2 : index
    %59 = memref.load %arg2[%c0_27, %c2_28] : memref<3x3xf32, #tpu.memory_space<smem>>
    %c0_29 = arith.constant 0 : index
    %c113 = arith.constant 113 : index
    %60 = vector.load %arg5[%c0_29, %c113] : memref<8x512xf32, #tpu.memory_space<vmem>>, vector<8x256xf32>
    %61 = vector.broadcast %59 : f32 to vector<8x256xf32>
    %62 = arith.mulf %61, %60 : vector<8x256xf32>
    %c1_30 = arith.constant 1 : index
    %c2_31 = arith.constant 2 : index
    %63 = memref.load %arg2[%c1_30, %c2_31] : memref<3x3xf32, #tpu.memory_space<smem>>
    %c0_32 = arith.constant 0 : index
    %c129 = arith.constant 129 : index
    %64 = vector.load %arg5[%c0_32, %c129] : memref<8x512xf32, #tpu.memory_space<vmem>>, vector<8x256xf32>
    %65 = vector.broadcast %63 : f32 to vector<8x256xf32>
    %66 = arith.mulf %65, %64 : vector<8x256xf32>
    %67 = arith.addf %62, %66 : vector<8x256xf32>
    %c2_33 = arith.constant 2 : index
    %c2_34 = arith.constant 2 : index
    %68 = memref.load %arg2[%c2_33, %c2_34] : memref<3x3xf32, #tpu.memory_space<smem>>
    %c0_35 = arith.constant 0 : index
    %c145 = arith.constant 145 : index
    %69 = vector.load %arg5[%c0_35, %c145] : memref<8x512xf32, #tpu.memory_space<vmem>>, vector<8x256xf32>
    %70 = vector.broadcast %68 : f32 to vector<8x256xf32>
    %71 = arith.mulf %70, %69 : vector<8x256xf32>
    %72 = arith.addf %67, %71 : vector<8x256xf32>
    %73 = vector.broadcast %26 : vector<1x256xf32> to vector<8x256xf32>
    %74 = arith.mulf %73, %44 : vector<8x256xf32>
    %75 = arith.addf %58, %74 : vector<8x256xf32>
    %76 = vector.broadcast %30 : vector<1x256xf32> to vector<8x256xf32>
    %77 = arith.mulf %76, %72 : vector<8x256xf32>
    %78 = arith.addf %75, %77 : vector<8x256xf32>
    %c0_36 = arith.constant 0 : index
    %79 = memref.load %arg3[%c0_36] : memref<1xf32, #tpu.memory_space<smem>>
    %80 = vector.broadcast %79 : f32 to vector<8x256xf32>
    %81 = arith.addf %78, %80 : vector<8x256xf32>
    %cst_37 = arith.constant 0.000000e+00 : f32
    %82 = vector.broadcast %cst_37 : f32 to vector<8x256xf32>
    %83 = arith.maximumf %81, %82 : vector<8x256xf32>
    %c0_38 = arith.constant 0 : index
    %c0_39 = arith.constant 0 : index
    %84 = vector.load %arg4[%c0_38, %c0_39] : memref<8x256xf32, #tpu.memory_space<vmem>>, vector<8x256xf32>
    tpu.vector_store %arg4[%c0_38, %c0_39], %83 {strides = array<i32>} : memref<8x256xf32, #tpu.memory_space<vmem>>, vector<8x256xf32>,
    return
  }
  func.func @transform_0(%arg0: i32) -> (i32, i32) {
    %c0_i32 = arith.constant 0 : i32
    %c0_i32_0 = arith.constant 0 : i32
    return %arg0, %c0_i32 : i32, i32
  }
  func.func @transform_1(%arg0: i32) -> (i32, i32) {
    %c0_i32 = arith.constant 0 : i32
    %c0_i32_0 = arith.constant 0 : i32
    %c0_i32_1 = arith.constant 0 : i32
    return %c0_i32, %c0_i32_0 : i32, i32
  }
  func.func @transform_2(%arg0: i32) -> i32 {
    %c0_i32 = arith.constant 0 : i32
    %c0_i32_0 = arith.constant 0 : i32
    return %c0_i32 : i32
  }
  func.func @transform_3(%arg0: i32) -> (i32, i32) {
    %c0_i32 = arith.constant 0 : i32
    %c0_i32_0 = arith.constant 0 : i32
    return %arg0, %c0_i32 : i32, i32
  }
}

</mosaic_0001>

<bundles_post_ra>
// kernel: tpu_custom_call.1
= control target key start
LH: loop header
LB: loop body
LE: loop exit
PB: predicated region body
PF: predicated region fallthrough
CT: control target
= control target key end

     0   :  { %9 = vsyncpa [#allocation5], 0  ;;  %s535_s0 = inlined_call_operand.hbm [shape: f32[8,256], index: 0, kind: input, shape index: {}]   ;;  %s536_s1 = inlined_call_operand.vmem [shape: f32[3,3], index: 1, kind: input, shape index: {}]   ;;  %s537_s2 = inlined_call_operand.<no memory space> [shape: f32[1], index: 2, kind: input, shape index: {}]   ;;  %s538_s3 = inlined_call_operand.hbm [shape: f32[8,256], index: 3, kind: output, shape index: {}]  }
   0x1   :  { %10 = vsyncpa [#allocation7], 0 }
   0x2   :  { %11 = vsyncpa [#allocation6], 0  ;;  %s28_s14 = sshll.u32 %s536_s1, 4  ;;  %s417_s15 = smov [#allocation4]   ;;  %s29_s14 = int_to_ptr.vmem [resolvable:$true] %s28_s14 }
   0x3   :  { %s18_s16 = sshll.u32 %s417_s15, 4  ;;  %s355_s19 = scalar_lea.hbm %s535_s0, 256  ;;  %s19_s16 = int_to_ptr.vmem [resolvable:$true] %s18_s16 }
   0x4   :  { %p356_p0 = scmp.ne.s32.totalorder %s535_s0, %s355_s19  ;;  %p359_p1 = scmp.lt.u32.totalorder %s355_s19, %s535_s0 }
   0x6   :  { %p361_p2 = pnand %p359_p1, %p356_p0 }
   0x8   :  { %364 = shalt.err (!%p361_p2)
}
   0x9   :  { %s365_s24 = scalar_lea.vmem %s19_s16, 256  ;;  %p370_p4 = scmp.lt.s32.totalorder %s19_s16, %s19_s16 }
   0xa   :  { %p366_p3 = scmp.ne.s32.totalorder %s19_s16, %s365_s24  ;;  %p371_p5 = scmp.lt.s32.totalorder %s365_s24, %s365_s24 }
   0xc   :  { %p372_p6 = por %p371_p5, %p370_p4 }
   0xe   :  { %p373_p7 = pnand %p372_p6, %p366_p3 }
  0x10   :  { %376 = shalt.err (!%p373_p7)
}
  0x11   :  { %21 = dma.hbm_to_vmem [thread:$0]  %s535_s0, 256, %s19_s16, [#allocation5]  }
  0x12   :  { %s377_s26 = scalar_lea.vmem %s29_s14, 64  ;;  %p382_p9 = scmp.lt.s32.totalorder %s29_s14, %s29_s14 }
  0x13   :  { %p378_p8 = scmp.ne.s32.totalorder %s29_s14, %s377_s26  ;;  %p383_p10 = scmp.lt.s32.totalorder %s377_s26, %s377_s26 }
  0x15   :  { %p384_p11 = por %p383_p10, %p382_p9 }
  0x17   :  { %p385_p12 = pnand %p384_p11, %p378_p8 }
  0x19   :  { %388 = shalt.err (!%p385_p12)
}
  0x1a   :  { %s418_s27 = smov [#allocation8]  }
  0x1b   :  { %31 = dma.vmem_to_smem %s29_s14, 64, %s418_s27, [#allocation7]  }
  0x1c   :  { %411 = dma.done.wait [#allocation5], 256  }
  0x1d   :  { %412 = vsyncadd [#allocation5], 4294967040 }
  0x1e   :  { %413 = dma.done.wait [#allocation7], 64  }
  0x1f   :  { %414 = vsyncadd [#allocation7], 4294967232 }
  0x20   :  { %40 = sfence }
  0x21   :  { %s338_s28 = sld [smem:[#allocation8 + $0x80]]  ;;  %v461_v0 = vld [vmem:[#allocation4 + $0x8] sm:$0xff]  ;;  %v463_v2 = vld [vmem:[#allocation4] sm:$0xff]  ;;  %s344_s0 = sld [smem:[#allocation8 + $0x82]]  ;;  %vm108_vm0 = vcmask 916480   ;;  %vm134_vm1 = vcmask 785408  }
  0x22   :  { %s339_s29 = sld [smem:[#allocation8 + $0x100]]  ;;  %s419_s30 = smov 112   ;;  %vm245_vm4 = vcmask 138240   ;;  %vm274_vm6 = vcmask 121856   ;;  %vm311_vm8 = vcmask 130048  }
  0x23   :  { %s345_s4 = sld [smem:[#allocation8 + $0x102]]  ;;  %s420_s5 = smov 96  }
  0x24   :  { %s86_s6 = sld [smem:[#allocation8]]  ;;  %s343_s7 = sld [smem:[#allocation8 + $0x2]] }
  0x25   :  { %s421_s8 = smov 17   ;;  %s488_s9 = sld [smem:[#allocation8 + $0x81]] }
  0x26   :  { %s342_s10 = sld [smem:[#allocation8 + $0x101]]  ;;  %s422_s11 = smov 15  }
  0x27   :  { %v95_v1 = vstv %s338_s28  ;;  %v193_v10 = vstv %s344_s0  ;;  %s340_s12 = sld [smem:[#allocation8 + $0x1]]  ;;  %s424_s15 = smov 16  }
  0x28   :  { %v96_v3 = vmul.f32 0.0, %v95_v1  ;;  %v98_v4 = vmul.f32 %v95_v1, %v461_v0  ;;  %v121_v5 = vstv %s339_s29  ;;  %v97_v7 = vmul.f32 %v95_v1, %v463_v2 }
  0x29   :  { %v122_v6 = vmul.f32 %v121_v5, %v463_v2  ;;  %v124_v8 = vmul.f32 0.0, %v121_v5  ;;  %v123_v9 = vmul.f32 %v121_v5, %v461_v0  ;;  %v195_v11 = vmul.f32 %v193_v10, %v461_v0 }
  0x2a   :  { %102 = vrot.lane.b32.xlu0 %v96_v3, %s419_s30  ;;  %106 = vrot.lane.b32.xlu1 %v98_v4, %s419_s30  ;;  %v194_v12 = vmul.f32 %v193_v10, %v463_v2  ;;  %v215_v13 = vstv %s345_s4  ;;  %v196_v15 = vmul.f32 0.0, %v193_v10  ;;  %v90_v20 = vstv %s86_s6 }
  0x2b   :  { %v216_v14 = vmul.f32 %v215_v13, %v463_v2  ;;  %v218_v16 = vmul.f32 0.0, %v215_v13  ;;  %v217_v17 = vmul.f32 %v215_v13, %v461_v0  ;;  %v93_v21 = vmul.f32 %v90_v20, %v461_v0 }
  0x2c   :  { %v91_v24 = vmul.f32 0.0, %v90_v20  ;;  %v188_v25 = vstv %s343_s7  ;;  %v92_v38 = vmul.f32 %v90_v20, %v463_v2  ;;  %v149_v54 = vstv %s488_s9 }
  0x2d   :  { %v189_v31 = vmul.f32 0.0, %v188_v25  ;;  %v190_v40 = vmul.f32 %v188_v25, %v463_v2  ;;  %v191_v47 = vmul.f32 %v188_v25, %v461_v0  ;;  %v150_v58 = vmul.f32 %v149_v54, %v463_v2 }
  0x2e   :  { %128 = vrot.lane.b32.xlu1 %v122_v6, %s420_s5  ;;  %104 = vrot.lane.b32.xlu0 %v97_v7, %s419_s30  ;;  %v166_v60 = vstv %s342_s10  ;;  %v151_v61 = vmul.f32 %v149_v54, %v461_v0  ;;  %v47_v3 = vlaneseq }
  0x2f   :  { %v167_v62 = vmul.f32 %v166_v60, %v463_v2  ;;  %v168_v63 = vmul.f32 %v166_v60, %v461_v0  ;;  %v169_v1 = vmul.f32 0.0, %v166_v60 }
  0x30   :  { %v48_v4 = vand.u32 127, %v47_v3 }
  0x32   :  { %132 = vrot.lane.b32.xlu1 %v124_v8, %s420_s5  ;;  %130 = vrot.lane.b32.xlu0 %v123_v9, %s420_s5  ;;  %v49_v5 = vadd.s32 128, %v48_v4  ;;  %v54_v7 = vand.u32 15, %v48_v4 }
  0x34   :  { %v61_v8 = vand.u32 15, %v49_v5  ;;  %vm74_vm2 = vcmp.ge.s32.totalorder %v54_v7, 1  ;;  %vm80_vm5 = vcmp.le.s32.totalorder %v54_v7, 14 }
  0x36   :  { %202 = vrot.lane.b32.xlu1 %v195_v11, %s419_s30  ;;  %200 = vrot.lane.b32.xlu0 %v194_v12, %s419_s30  ;;  %vm75_vm3 = vcmp.ge.s32.totalorder %v61_v8, 1  ;;  %v423_v11 = vmov 0.0   ;;  %vm81_vm7 = vcmp.le.s32.totalorder %v61_v8, 14 }
  0x37   :  { %v334_v12 = vsel %vm74_vm2, 1.0, %v423_v11  ;;  %v335_v13 = vsel %vm75_vm3, 1.0, %v423_v11  ;;  %v336_v20 = vsel %vm80_vm5, 1.0, %v423_v11 }
  0x3a   :  { %222 = vrot.lane.b32.xlu1 %v216_v14, %s420_s5  ;;  %204 = vrot.lane.b32.xlu0 %v196_v15, %s419_s30 }
  0x3e   :  { %226 = vrot.lane.b32.xlu1 %v218_v16, %s420_s5  ;;  %224 = vrot.lane.b32.xlu0 %v217_v17, %s420_s5 }
  0x9c   :  { %v103_v18 = vpop.permute.xlu0 %102  ;;  %v107_v19 = vpop.permute.xlu1 %106 }
  0x9d   :  { %v116_v27 = vadd.f32 %v107_v19, %v93_v21 }
  0xa0   :  { %v129_v22 = vpop.permute.xlu1 %128  ;;  %v105_v23 = vpop.permute.xlu0 %104 }
  0xa1   :  { %v109_v26 = vsel %vm108_vm0, %v103_v18, %v105_v23  ;;  %v110_v39 = vsel %vm108_vm0, %v105_v23, %v107_v19 }
  0xa2   :  { %v114_v32 = vadd.f32 %v109_v26, %v91_v24  ;;  %v115_v46 = vadd.f32 %v110_v39, %v92_v38 }
  0xa4   :  { %v133_v28 = vpop.permute.xlu1 %132  ;;  %v131_v29 = vpop.permute.xlu0 %130  ;;  %v140_v37 = vadd.f32 %v129_v22, %v114_v32 }
  0xa5   :  { %v136_v30 = vsel %vm134_vm1, %v131_v29, %v133_v28  ;;  %v135_v45 = vsel %vm134_vm1, %v129_v22, %v131_v29  ;;  %v337_v22 = vsel %vm81_vm7, 1.0, %v423_v11 }
  0xa6   :  { %v142_v33 = vadd.f32 %v136_v30, %v116_v27  ;;  %v141_v52 = vadd.f32 %v135_v45, %v115_v46  ;;  %v144_v30 = vstv %s340_s12 }
  0xa7   :  { %v147_v32 = vmul.f32 %v144_v30, %v461_v0 }
  0xa8   :  { %v203_v34 = vpop.permute.xlu1 %202  ;;  %243 = vrot.lane.b32.xlu0 %v142_v33, %s421_s8  ;;  %v201_v35 = vpop.permute.xlu0 %200  ;;  %v146_v33 = vmul.f32 %v144_v30, %v463_v2 }
  0xa9   :  { %v211_v36 = vadd.f32 %v201_v35, %v189_v31  ;;  %v206_v43 = vsel %vm108_vm0, %v201_v35, %v203_v34  ;;  %v145_v31 = vmul.f32 0.0, %v144_v30 }
  0xaa   :  { %v212_v48 = vadd.f32 %v206_v43, %v190_v40 }
  0xac   :  { %v223_v41 = vpop.permute.xlu1 %222  ;;  %239 = vrot.lane.b32.xlu0 %v140_v37, %s421_s8  ;;  %v205_v42 = vpop.permute.xlu0 %204 }
  0xad   :  { %v233_v44 = vadd.f32 %v223_v41, %v211_v36  ;;  %v207_v49 = vsel %vm108_vm0, %v203_v34, %v205_v42 }
  0xae   :  { %v213_v57 = vadd.f32 %v207_v49, %v191_v47  ;;  %v295_v49 = vstv %s537_s2  ;;  %s425_s2 = smov [#allocation9]  }
  0xaf   :  { %268 = vrot.lane.b32.xlu1 %v233_v44, %s422_s11  ;;  %s324_s16 = sshll.u32 %s425_s2, 4  ;;  %s325_s16 = int_to_ptr.vmem [resolvable:$true] %s324_s16 }
  0xb0   :  { %v227_v50 = vpop.permute.xlu1 %226  ;;  %v225_v51 = vpop.permute.xlu0 %224  ;;  %s389_s17 = scalar_lea.vmem %s325_s16, 256  ;;  %p394_p0 = scmp.lt.s32.totalorder %s325_s16, %s325_s16 }
  0xb1   :  { %v228_v53 = vsel %vm134_vm1, %v223_v41, %v225_v51  ;;  %v229_v55 = vsel %vm134_vm1, %v225_v51, %v227_v50  ;;  %p390_p13 = scmp.ne.s32.totalorder %s325_s16, %s389_s17  ;;  %p395_p1 = scmp.lt.s32.totalorder %s389_s17, %s389_s17 }
  0xb2   :  { %v234_v56 = vadd.f32 %v228_v53, %v212_v48  ;;  %v235_v59 = vadd.f32 %v229_v55, %v213_v57 }
  0xb3   :  { %241 = vrot.lane.b32.xlu1 %v141_v52, %s421_s8  ;;  %p396_p2 = por %p395_p1, %p394_p0 }
  0xb4   :  { %270 = vrot.lane.b32.xlu0 %v234_v56, %s422_s11 }
  0xb5   :  { %p397_p3 = pnand %p396_p2, %p390_p13 }
  0xb7   :  { %272 = vrot.lane.b32.xlu1 %v235_v59, %s422_s11 }
  0xb8   :  { %154 = vrot.lane.b32.xlu0 %v150_v58, %s419_s30 }
  0xbb   :  { %156 = vrot.lane.b32.xlu1 %v151_v61, %s419_s30 }
  0xbc   :  { %173 = vrot.lane.b32.xlu0 %v167_v62, %s420_s5 }
  0xbf   :  { %175 = vrot.lane.b32.xlu1 %v168_v63, %s420_s5 }
  0xc0   :  { %177 = vrot.lane.b32.xlu0 %v169_v1, %s420_s5 }
 0x11a   :  { %v244_v6 = vpop.permute.xlu0 %243 }
 0x11e   :  { %v240_v10 = vpop.permute.xlu0 %239 }
 0x121   :  { %v269_v9 = vpop.permute.xlu1 %268 }
 0x125   :  { %v242_v14 = vpop.permute.xlu1 %241 }
 0x126   :  { %v246_v15 = vsel %vm245_vm4, %v240_v10, %v242_v14  ;;  %v247_v16 = vsel %vm245_vm4, %v242_v14, %v244_v6  ;;  %v271_v17 = vpop.permute.xlu0 %270 }
 0x127   :  { %v250_v18 = vmul.f32 %v334_v12, %v246_v15  ;;  %v251_v19 = vmul.f32 %v335_v13, %v247_v16  ;;  %v275_v21 = vsel %vm274_vm6, %v269_v9, %v271_v17 }
 0x128   :  { %v279_v25 = vmul.f32 %v336_v20, %v275_v21 }
 0x129   :  { %256 = vrot.lane.b32.xlu0 %v251_v19, %s419_s30  ;;  %254 = vrot.lane.b32.xlu1 %v250_v18, %s419_s30  ;;  %v273_v23 = vpop.permute.xlu1 %272 }
 0x12a   :  { %v276_v24 = vsel %vm274_vm6, %v271_v17, %v273_v23  ;;  %v155_v27 = vpop.permute.xlu0 %154 }
 0x12b   :  { %v280_v26 = vmul.f32 %v337_v22, %v276_v24  ;;  %v162_v37 = vadd.f32 %v155_v27, %v145_v31 }
 0x12d   :  { %283 = vrot.lane.b32.xlu1 %v279_v25, %s419_s30  ;;  %285 = vrot.lane.b32.xlu0 %v280_v26, %s419_s30  ;;  %v157_v29 = vpop.permute.xlu1 %156 }
 0x12e   :  { %v174_v28 = vpop.permute.xlu0 %173  ;;  %v158_v34 = vsel %vm108_vm0, %v155_v27, %v157_v29  ;;  %v164_v38 = vadd.f32 %v157_v29, %v147_v32 }
 0x12f   :  { %v163_v39 = vadd.f32 %v158_v34, %v146_v33  ;;  %v184_v44 = vadd.f32 %v174_v28, %v162_v37 }
 0x131   :  { %v176_v36 = vpop.permute.xlu1 %175 }
 0x132   :  { %v178_v35 = vpop.permute.xlu0 %177  ;;  %v179_v41 = vsel %vm134_vm1, %v174_v28, %v176_v36 }
 0x133   :  { %v180_v40 = vsel %vm134_vm1, %v176_v36, %v178_v35  ;;  %v185_v0 = vadd.f32 %v179_v41, %v163_v39 }
 0x134   :  { %v186_v45 = vadd.f32 %v180_v40, %v164_v38 }
 0x19b   :  { %v257_v42 = vpop.permute.xlu0 %256  ;;  %v255_v43 = vpop.permute.xlu1 %254 }
 0x19c   :  { %v258_v46 = vsel %vm108_vm0, %v255_v43, %v257_v42  ;;  %v264_v47 = vadd.f32 %v257_v42, %v186_v45  ;;  %v262_v2 = vadd.f32 %v255_v43, %v184_v44 }
 0x19d   :  { %v263_v48 = vadd.f32 %v258_v46, %v185_v0 }
 0x19f   :  { %v286_v50 = vpop.permute.xlu0 %285  ;;  %v284_v51 = vpop.permute.xlu1 %283 }
 0x1a0   :  { %v293_v52 = vadd.f32 %v286_v50, %v264_v47  ;;  %v287_v53 = vsel %vm108_vm0, %v284_v51, %v286_v50  ;;  %v291_v54 = vadd.f32 %v284_v51, %v262_v2 }
 0x1a1   :  { %v292_v55 = vadd.f32 %v287_v53, %v263_v48 }
 0x1a2   :  { %v296_v56 = vadd.f32 %v295_v49, %v291_v54  ;;  %v298_v58 = vadd.f32 %v295_v49, %v293_v52 }
 0x1a3   :  { %v297_v57 = vadd.f32 %v295_v49, %v292_v55 }
 0x1a4   :  { %v299_v59 = vmax.f32 %v296_v56, 0.0  ;;  %v301_v61 = vmax.f32 %v298_v58, 0.0 }
 0x1a5   :  { %v300_v60 = vmax.f32 %v297_v57, 0.0 }
 0x1a6   :  { %305 = vrot.lane.b32.xlu1 %v299_v59, %s424_s15 }
 0x1a7   :  { %307 = vrot.lane.b32.xlu0 %v300_v60, %s424_s15 }
 0x1aa   :  { %309 = vrot.lane.b32.xlu1 %v301_v61, %s424_s15 }
 0x218   :  { %v306_v62 = vpop.permute.xlu1 %305 }
 0x219   :  { %v308_v63 = vpop.permute.xlu0 %307 }
 0x21a   :  { %v312_v1 = vsel %vm311_vm8, %v306_v62, %v308_v63 }
 0x21b   :  { %316 = vst [vmem:[#allocation9] sm:$0xff] %v312_v1 }
 0x21c   :  { %v310_v3 = vpop.permute.xlu1 %309 }
 0x21d   :  { %v313_v4 = vsel %vm311_vm8, %v308_v63, %v310_v3 }
 0x21e   :  { %317 = vst [vmem:[#allocation9 + $0x8] sm:$0xff] %v313_v4 }
 0x21f   :  { %400 = shalt.err (!%p397_p3)
}
 0x220   :  { %s401_s20 = scalar_lea.hbm %s538_s3, 256 }
 0x221   :  { %p402_p4 = scmp.ne.s32.totalorder %s538_s3, %s401_s20  ;;  %p405_p5 = scmp.lt.u32.totalorder %s401_s20, %s538_s3 }
 0x223   :  { %p407_p6 = pnand %p405_p5, %p402_p4 }
 0x225   :  { %410 = shalt.err (!%p407_p6)
}
 0x226   :  { %327 = dma.vmem_to_hbm [thread:$0]  %s325_s16, 256, %s538_s3, [#allocation6]  }
 0x227   :  { %415 = dma.done.wait [#allocation6], 256  }
 0x228   :  { %416 = vsyncadd [#allocation6], 4294967040 }
 0x229   :  { %331 = vsyncpa [#allocation5], 1 }
 0x22a   :  { %332 = vsyncpa [#allocation6], 1 }
 0x22b   :  { %333 = vsyncpa [#allocation7], 1 }

</bundles_post_ra>
